<compile_context>
chip_gen: v5e
topology: v5e:2x2
jax: 0.10.0
libtpu: 0.0.40
codegen_flags: <defaults>
</compile_context>

<pallas_src>
import functools
import math

import jax
import jax.numpy as jnp
from jax import lax
from jax.experimental import pallas as pl
from jax.experimental.pallas import tpu as pltpu

_LANE = 128


def _round_up(x, m):
    return (x + m - 1) // m * m


def prepare_weights(w_qkv, w_out, b_out, *, head_size, compute_dtype=jnp.bfloat16):
    """One-time weight prep (call OUTSIDE the hot path).

    w_qkv : (3H, E)  PyTorch Linear(embed, 3*head_size, bias=False).weight
    w_out : (H, H)   PyTorch Linear(head_size, head_size).weight
    b_out : (H,)     PyTorch Linear(head_size, head_size).bias
    Returns (wqkv_p (E, 3*Hp), wo_p (Hp, Hp), bo_p (1, Hp)); Hp = H rounded up
    to a multiple of 128 (zero padded), matmul weights cast to compute_dtype.
    The 1/sqrt(H) attention scale is folded into the Wq columns.
    """
    H = head_size
    Hp = _round_up(H, _LANE)
    scale = 1.0 / math.sqrt(H)

    wq = (w_qkv[:H].T * scale).astype(jnp.float32)      # (E, H), scale folded in
    wk = w_qkv[H:2 * H].T.astype(jnp.float32)           # (E, H)
    wv = w_qkv[2 * H:].T.astype(jnp.float32)            # (E, H)

    def pad_cols(w):
        return jnp.pad(w, ((0, 0), (0, Hp - H)))

    wqkv_p = jnp.concatenate([pad_cols(wq), pad_cols(wk), pad_cols(wv)], axis=1)
    wqkv_p = wqkv_p.astype(compute_dtype)               # (E, 3*Hp)

    wo_p = jnp.pad(w_out.T.astype(jnp.float32), ((0, Hp - H), (0, Hp - H)))
    wo_p = wo_p.astype(compute_dtype)                   # (Hp, Hp)

    bo_p = jnp.pad(b_out.astype(jnp.float32), (0, Hp - H)).reshape(1, Hp)  # f32
    return wqkv_p, wo_p, bo_p


def _decoder_kernel(x_ref, wqkv_ref, wo_ref, bo_ref, o_ref, *, blk, n_sub, hp):
    """Fused qkv-proj + block-diagonal causal flash attention + out-proj.

    Each grid step handles one (batch, row-tile) of `n_sub` folded flash blocks
    (rows = n_sub * blk) so the projection matmuls see a large M dimension.
    """
    x = x_ref[0]                                  # (rows, E) in compute dtype
    cdt = x.dtype

    # fused q/k/v projection: single MXU push, M = rows, N = 3*Hp, f32 accumulate
    qkv = jnp.dot(x, wqkv_ref[...], preferred_element_type=jnp.float32)

    # local causal (decoder) mask of one flash block: tril[i:i+blk, i:i+blk]
    # in the reference is the same lower-triangular pattern for every block.
    row = lax.broadcasted_iota(jnp.int32, (blk, blk), 0)
    col = lax.broadcasted_iota(jnp.int32, (blk, blk), 1)
    causal = row >= col

    blocks = []
    for s in range(n_sub):                        # static unroll over folded blocks
        lo = s * blk
        q = qkv[lo:lo + blk, 0 * hp:1 * hp].astype(cdt)   # scale already folded in
        k = qkv[lo:lo + blk, 1 * hp:2 * hp].astype(cdt)
        v = qkv[lo:lo + blk, 2 * hp:3 * hp].astype(cdt)

        # q @ k^T via dot_general (no materialized transpose / XLU vxpose)
        scores = lax.dot_general(q, k, (((1,), (1,)), ((), ())),
                                 preferred_element_type=jnp.float32)
        scores = jnp.where(causal, scores, -1e30)          # causal mask
        scores = scores - jnp.max(scores, axis=-1, keepdims=True)
        p = jnp.exp(scores)
        denom = jnp.sum(p, axis=-1, keepdims=True) + 1e-6   # NOT plain softmax
        p = p * pl.reciprocal(denom, approx=True)           # EUP, not VALU divide
        blocks.append(jnp.dot(p.astype(cdt), v, preferred_element_type=jnp.float32))

    attn = blocks[0] if n_sub == 1 else jnp.concatenate(blocks, axis=0)  # (rows, Hp) f32

    out = jnp.dot(attn.astype(cdt), wo_ref[...], preferred_element_type=jnp.float32)
    out = out + bo_ref[...]                       # bias added once per tile
    o_ref[0] = out.astype(o_ref.dtype)            # lane-dense (Hp % 128 == 0) store


def self_attention_decoder(x, wqkv_p, wo_p, bo_p, *, head_size, flash_block=128,
                           rows_per_step=512, compute_dtype=jnp.bfloat16):
    """JAX/Pallas equivalent of SelfAttentionDecoder.forward(x, mask=None)."""
    B, S, E = x.shape
    Hp = wo_p.shape[0]

    blk = min(flash_block, S)                     # one flash-attention block
    assert S % blk == 0, "seq_len must be a multiple of the flash block"
    # TODO(synk): partial trailing flash blocks (S % flash_block != 0, S > flash_block)
    # are not handled.
    n_blk = S // blk

    # Fold several (block-diagonal) flash blocks into one grid step so the
    # projection matmuls see an MXU-sized M and the ~0.35us/step grid overhead
    # is amortized.
    n_sub = 1
    for f in range(n_blk, 0, -1):
        if n_blk % f == 0 and blk * f <= max(rows_per_step, blk):
            n_sub = f
            break
    rows = blk * n_sub
    n_tiles = n_blk // n_sub

    # Explicit VMEM budget: resident weights + double-buffered x/out tiles +
    # f32 intermediates, with 2x headroom; capped at 64 MiB (v7x physical).
    csize = jnp.dtype(compute_dtype).itemsize
    resident = (E * 3 * Hp + Hp * Hp) * csize + Hp * 4
    per_step = 2 * rows * E * csize + 2 * rows * Hp * 4
    interm = rows * 4 * Hp * 4 + 4 * blk * blk * 4
    vmem_limit = int(min(64 << 20, max(16 << 20, 2 * (resident + per_step + interm))))
    # TODO(synk): for large E/Hp on v7x (64 MiB VMEM), add a third "arbitrary"
    # grid axis K-tiling the contraction dims with an f32 VMEM accumulator.

    kernel = functools.partial(_decoder_kernel, blk=blk, n_sub=n_sub, hp=Hp)

    out_padded = pl.pallas_call(
        kernel,
        out_shape=jax.ShapeDtypeStruct((B, S, Hp), jnp.float32),
        grid_spec=pltpu.PrefetchScalarGridSpec(
            num_scalar_prefetch=0,
            grid=(B, n_tiles),
            in_specs=[
                pl.BlockSpec((1, rows, E), lambda b, t: (b, t, 0)),   # x tile
                pl.BlockSpec((E, 3 * Hp), lambda b, t: (0, 0)),       # fused Wqkv
                pl.BlockSpec((Hp, Hp), lambda b, t: (0, 0)),          # Wo
                pl.BlockSpec((1, Hp), lambda b, t: (0, 0)),           # bias
            ],
            out_specs=pl.BlockSpec((1, rows, Hp), lambda b, t: (b, t, 0)),
        ),
        compiler_params=pltpu.CompilerParams(
            dimension_semantics=("parallel", "parallel"),
            vmem_limit_bytes=vmem_limit),
    )(x.astype(compute_dtype), wqkv_p, wo_p, bo_p)

    return out_padded[..., :head_size]


def _reference(x, w_qkv, w_out, b_out, *, head_size, flash_block=128):
    """Pure-JAX replica of SelfAttentionDecoder.forward (mask=None, is_decoder=True)."""
    B, S, E = x.shape
    H = head_size
    qkv = x @ w_qkv.T                                     # (B, S, 3H)
    q, k, v = qkv[..., :H], qkv[..., H:2 * H], qkv[..., 2 * H:]
    out = jnp.zeros_like(q)
    for i in range(0, S, flash_block):
        qb = q[:, i:i + flash_block]
        kb = k[:, i:i + flash_block]
        vb = v[:, i:i + flash_block]
        n = qb.shape[1]
        s = jnp.einsum("bqd,bkd->bqk", qb, kb) / (H ** 0.5)
        tril = jnp.tril(jnp.ones((n, n)))
        s = jnp.where(tril == 0, -jnp.inf, s)             # decoder causal mask
        s = s - jnp.max(s, axis=-1, keepdims=True)
        s = jnp.exp(s)
        s = s / (jnp.sum(s, axis=-1, keepdims=True) + 1e-6)
        out = out.at[:, i:i + flash_block].set(jnp.einsum("bqk,bkd->bqd", s, vb))
    return out @ w_out.T + b_out


if __name__ == "__main__":
    # SelfAttentionDecoder(embedding_size=32, head_size=16, block_size=8)
    # (block_size is the context size for the tril buffer; flash block stays 128)
    B, S, E, H = 2, 8, 32, 16

    key = jax.random.PRNGKey(0)
    kx, kqkv, kwo, kbo = jax.random.split(key, 4)

    x = jax.random.normal(kx, (B, S, E), dtype=jnp.float32)
    w_qkv = jax.random.normal(kqkv, (3 * H, E), dtype=jnp.float32) * 0.05
    w_out = jax.random.normal(kwo, (H, H), dtype=jnp.float32) * 0.05
    b_out = jax.random.normal(kbo, (H,), dtype=jnp.float32) * 0.05

    y_ref = _reference(x, w_qkv, w_out, b_out, head_size=H)

    # f32 matmul path: tight correctness check
    wq32, wo32, bo32 = prepare_weights(w_qkv, w_out, b_out, head_size=H,
                                       compute_dtype=jnp.float32)
    y32 = jax.block_until_ready(
        self_attention_decoder(x, wq32, wo32, bo32, head_size=H,
                               compute_dtype=jnp.float32))
    assert y32.shape == (B, S, H)
    assert jnp.allclose(y32, y_ref, atol=2e-4, rtol=2e-4), "f32 kernel mismatch"

    # bf16 matmul path (default; what v6e/v7x want): looser tolerance
    wqb, wob, bob = prepare_weights(w_qkv, w_out, b_out, head_size=H)
    yb = jax.block_until_ready(
        self_attention_decoder(x, wqb, wob, bob, head_size=H))
    assert yb.shape == (B, S, H)
    assert jnp.allclose(yb, y_ref, atol=1e-2, rtol=1e-2), "bf16 kernel mismatch"

    print("KERNEL_OK")
</pallas_src>

<mosaic_0001>
module attributes {stable_mosaic.version = 11 : i64} {
  func.func @_decoder_kernel(%arg0: i32, %arg1: i32, %arg2: memref<1x8x32xf32, #tpu.memory_space<vmem>>, %arg3: memref<32x384xf32, #tpu.memory_space<vmem>>, %arg4: memref<128x128xf32, #tpu.memory_space<vmem>>, %arg5: memref<1x128xf32, #tpu.memory_space<vmem>>, %arg6: memref<1x8x128xf32, #tpu.memory_space<vmem>>) attributes {dimension_semantics = [#tpu.dimension_semantics<parallel>, #tpu.dimension_semantics<parallel>], iteration_bounds = array<i64: 2, 1>, scalar_prefetch = 0 : i64, scratch_operands = 0 : i64, tpu.core_type = #tpu.core_type<tc>, window_params = [{transform_indices = @transform_0, window_bounds = array<i64: 1, 8, 32>}, {pipeline_mode = #tpu.pipeline_mode<synchronous>, transform_indices = @transform_1, window_bounds = array<i64: 32, 384>}, {pipeline_mode = #tpu.pipeline_mode<synchronous>, transform_indices = @transform_2, window_bounds = array<i64: 128, 128>}, {pipeline_mode = #tpu.pipeline_mode<synchronous>, transform_indices = @transform_3, window_bounds = array<i64: 1, 128>}, {transform_indices = @transform_4, window_bounds = array<i64: 1, 8, 128>}]} {
    %c0 = arith.constant 0 : index
    %c0_0 = arith.constant 0 : index
    %c0_1 = arith.constant 0 : index
    %0 = vector.load %arg2[%c0, %c0_0, %c0_1] : memref<1x8x32xf32, #tpu.memory_space<vmem>>, vector<1x8x32xf32>
    %1 = vector.shape_cast %0 : vector<1x8x32xf32> to vector<8x32xf32>
    %c0_2 = arith.constant 0 : index
    %c0_3 = arith.constant 0 : index
    %2 = vector.load %arg3[%c0_2, %c0_3] : memref<32x384xf32, #tpu.memory_space<vmem>>, vector<32x384xf32>
    %cst = arith.constant dense<0.000000e+00> : vector<8x384xf32>
    %3 = tpu.matmul %1, %2, %cst {dimension_numbers = #tpu.dot_dimension_numbers<[1], [0], [0], [1], [0, 0, 1, 1], [], []>} : vector<8x32xf32>, vector<32x384xf32>, vector<8x384xf32> -> vector<8x384xf32>
    %4 = tpu.iota {dimensions = array<i32: 0>} : vector<8x8xi32>
    %5 = tpu.iota {dimensions = array<i32: 1>} : vector<8x8xi32>
    %6 = arith.cmpi sge, %4, %5 : vector<8x8xi32>
    %7 = vector.extract_strided_slice %3 {offsets = [0, 0], sizes = [8, 128], strides = [1, 1]} : vector<8x384xf32> to vector<8x128xf32>
    %8 = vector.extract_strided_slice %3 {offsets = [0, 128], sizes = [8, 128], strides = [1, 1]} : vector<8x384xf32> to vector<8x128xf32>
    %9 = vector.extract_strided_slice %3 {offsets = [0, 256], sizes = [8, 128], strides = [1, 1]} : vector<8x384xf32> to vector<8x128xf32>
    %cst_4 = arith.constant dense<0.000000e+00> : vector<8x8xf32>
    %10 = tpu.matmul %7, %8, %cst_4 {dimension_numbers = #tpu.dot_dimension_numbers<[1], [1], [0], [0], [0, 0, 1, 0], [], []>} : vector<8x128xf32>, vector<8x128xf32>, vector<8x8xf32> -> vector<8x8xf32>
    %cst_5 = arith.constant -1.000000e+30 : f32
    %11 = vector.broadcast %cst_5 : f32 to vector<8x8xf32>
    %12 = arith.select %6, %10, %11 : vector<8x8xi1>, vector<8x8xf32>
    %cst_6 = arith.constant dense<0xFF800000> : vector<8xf32>
    %13 = vector.multi_reduction <maximumf>, %12, %cst_6 [1] : vector<8x8xf32> to vector<8xf32>
    %14 = vector.shape_cast %13 : vector<8xf32> to vector<8x1xf32>
    %15 = vector.broadcast %14 : vector<8x1xf32> to vector<8x8xf32>
    %16 = arith.subf %12, %15 : vector<8x8xf32>
    %17 = math.exp %16 : vector<8x8xf32>
    %cst_7 = arith.constant dense<0.000000e+00> : vector<8xf32>
    %18 = vector.multi_reduction <add>, %17, %cst_7 [1] : vector<8x8xf32> to vector<8xf32>
    %19 = vector.shape_cast %18 : vector<8xf32> to vector<8x1xf32>
    %cst_8 = arith.constant 9.99999997E-7 : f32
    %20 = vector.broadcast %cst_8 : f32 to vector<8x1xf32>
    %21 = arith.addf %19, %20 : vector<8x1xf32>
    %22 = tpu.reciprocal %21 {approx = true} : vector<8x1xf32> -> vector<8x1xf32>
    %23 = vector.broadcast %22 : vector<8x1xf32> to vector<8x8xf32>
    %24 = arith.mulf %17, %23 : vector<8x8xf32>
    %cst_9 = arith.constant dense<0.000000e+00> : vector<8x128xf32>
    %25 = tpu.matmul %24, %9, %cst_9 {dimension_numbers = #tpu.dot_dimension_numbers<[1], [0], [0], [1], [0, 0, 1, 1], [], []>} : vector<8x8xf32>, vector<8x128xf32>, vector<8x128xf32> -> vector<8x128xf32>
    %c0_10 = arith.constant 0 : index
    %c0_11 = arith.constant 0 : index
    %26 = vector.load %arg4[%c0_10, %c0_11] : memref<128x128xf32, #tpu.memory_space<vmem>>, vector<128x128xf32>
    %cst_12 = arith.constant dense<0.000000e+00> : vector<8x128xf32>
    %27 = tpu.matmul %25, %26, %cst_12 {dimension_numbers = #tpu.dot_dimension_numbers<[1], [0], [0], [1], [0, 0, 1, 1], [], []>} : vector<8x128xf32>, vector<128x128xf32>, vector<8x128xf32> -> vector<8x128xf32>
    %c0_13 = arith.constant 0 : index
    %c0_14 = arith.constant 0 : index
    %28 = vector.load %arg5[%c0_13, %c0_14] : memref<1x128xf32, #tpu.memory_space<vmem>>, vector<1x128xf32>
    %29 = vector.broadcast %28 : vector<1x128xf32> to vector<8x128xf32>
    %30 = arith.addf %27, %29 : vector<8x128xf32>
    %c0_15 = arith.constant 0 : index
    %c0_16 = arith.constant 0 : index
    %c0_17 = arith.constant 0 : index
    %31 = vector.load %arg6[%c0_15, %c0_16, %c0_17] : memref<1x8x128xf32, #tpu.memory_space<vmem>>, vector<1x8x128xf32>
    %32 = vector.shape_cast %31 : vector<1x8x128xf32> to vector<8x128xf32>
    %33 = vector.shape_cast %30 : vector<8x128xf32> to vector<1x8x128xf32>
    tpu.vector_store %arg6[%c0_15, %c0_16, %c0_17], %33 {strides = array<i32>} : memref<1x8x128xf32, #tpu.memory_space<vmem>>, vector<1x8x128xf32>,
    return
  }
  func.func @transform_0(%arg0: i32, %arg1: i32) -> (i32, i32, i32) {
    %c0_i32 = arith.constant 0 : i32
    %c0_i32_0 = arith.constant 0 : i32
    return %arg0, %arg1, %c0_i32 : i32, i32, i32
  }
  func.func @transform_1(%arg0: i32, %arg1: i32) -> (i32, i32) {
    %c0_i32 = arith.constant 0 : i32
    %c0_i32_0 = arith.constant 0 : i32
    %c0_i32_1 = arith.constant 0 : i32
    return %c0_i32, %c0_i32_0 : i32, i32
  }
  func.func @transform_2(%arg0: i32, %arg1: i32) -> (i32, i32) {
    %c0_i32 = arith.constant 0 : i32
    %c0_i32_0 = arith.constant 0 : i32
    %c0_i32_1 = arith.constant 0 : i32
    return %c0_i32, %c0_i32_0 : i32, i32
  }
  func.func @transform_3(%arg0: i32, %arg1: i32) -> (i32, i32) {
    %c0_i32 = arith.constant 0 : i32
    %c0_i32_0 = arith.constant 0 : i32
    %c0_i32_1 = arith.constant 0 : i32
    return %c0_i32, %c0_i32_0 : i32, i32
  }
  func.func @transform_4(%arg0: i32, %arg1: i32) -> (i32, i32, i32) {
    %c0_i32 = arith.constant 0 : i32
    %c0_i32_0 = arith.constant 0 : i32
    return %arg0, %arg1, %c0_i32 : i32, i32, i32
  }
}

</mosaic_0001>

<bundles_post_ra>
// kernel: tpu_custom_call.1
= control target key start
LH: loop header
LB: loop body
LE: loop exit
PB: predicated region body
PF: predicated region fallthrough
CT: control target
= control target key end

     0   :  { %9 = vsyncpa [#allocation3], 0  ;;  %s1040_s0 = inlined_call_operand.hbm [shape: f32[2,8,32], index: 0, kind: input, shape index: {}]   ;;  %s1041_s1 = inlined_call_operand.hbm [shape: f32[32,384], index: 1, kind: input, shape index: {}]   ;;  %s1042_s2 = inlined_call_operand.hbm [shape: f32[128,128], index: 2, kind: input, shape index: {}]   ;;  %s1043_s3 = inlined_call_operand.vmem [shape: f32[1,128], index: 3, kind: input, shape index: {}]   ;;  %s1044_s4 = inlined_call_operand.hbm [shape: f32[2,8,128], index: 4, kind: output, shape index: {}]  }
   0x1   :  { %11 = vsyncpa [#allocation3 + $0x1], 0 }
   0x2   :  { %12 = vsyncpa [#allocation6], 0 }
   0x3   :  { %13 = vsyncpa [#allocation4], 0 }
   0x4   :  { %15 = vsyncpa [#allocation4 + $0x1], 0  ;;  %s883_s15 = smov 0   ;;  %s885_s16 = smov 0  }
   0x5   :  { %s887_s17 = smov 0   ;;  %s889_s18 = smov 0  }
   0x6   :  { %s891_s19 = smov 0   ;;  %s893_s20 = smov 0  }
   0x7 LB: > { %s561_s21 = sadd.s32 4294967295, %s850_s20   ;;  %p563_p0 = scmp.ge.s32.totalorder %s850_s20, 1  ;;  %s850_s20 = sphi %s893_s20, %s21_s20   ;;  %s846_s19 = sphi %s891_s19, %s1054_s19   ;;  %s842_s18 = sphi %s889_s18, %s1053_s18   ;;  %s838_s17 = sphi %s887_s17, %s1052_s17   ;;  %s834_s16 = sphi %s885_s16, %s1051_s16   ;;  %s830_s15 = sphi %s883_s15, %s1050_s15  }
   0x8   : > { %p917_p1 = scmp.eq.s32.totalorder %s561_s21, 0  ;;  %p157_p2 = scmp.lt.s32.totalorder %s850_s20, 3 }
   0x9   : > { %s168_s25 = sshll.u32 %s1041_s1, 4  ;;  %s852_s27 = smov [#allocation5]   ;;  %s169_s25 = int_to_ptr.hbm [resolvable:$true] %s168_s25 }
   0xa   : > { %p925_p3 = pnand %p563_p0, %p157_p2  ;;  %s170_s28 = sshll.u32 %s852_s27, 4  ;;  %s171_s28 = int_to_ptr.vmem [resolvable:$true] %s170_s28 }
   0xb   : > { %p566_p6 = scmp.ge.s32.totalorder %s850_s20, 2  ;;  %s182_s5 = sshll.u32 %s1042_s2, 4  ;;  %s183_s5 = int_to_ptr.hbm [resolvable:$true] %s182_s5 }
   0xc   : > { %p594_p4 = pneg %p925_p3  ;;  %s853_s6 = smov 384  }
   0xd   : > { %s854_s7 = smov 24   ;;  %s855_s8 = smov [#allocation7]  }
   0xe   : > { %p595_p5 = pnand %p594_p4, %p917_p1  ;;  %s184_s9 = sshll.u32 %s855_s8, 4  ;;  %s185_s9 = int_to_ptr.vmem [resolvable:$true] %s184_s9 }
   0xf   : > { %s856_s10 = smov 128   ;;  %s857_s11 = smov 8  }
  0x10   : > { %597 = dma.hbm_to_vmem [thread:$0]  (!%p595_p5), %s169_s25, 1536, %s171_s28, [#allocation6], %s853_s6, %s853_s6, %s854_s7  }
  0x11   : > { %600 = dma.hbm_to_vmem [thread:$0]  (!%p595_p5), %s183_s5, 2048, %s185_s9, [#allocation6], %s856_s10, %s856_s10, %s857_s11  }
  0x12   : > { %s33_s12 = sadd.s32 1, %s846_s19  ;;  %s562_s13 = sadd.s32 4294967294, %s850_s20  }
  0x13   : > { %p35_p7 = scmp.ge.s32.totalorder %s33_s12, 2  ;;  %s42_s14 = sadd.s32 1, %s838_s17 }
  0x14   : > { %p49_p8 = scmp.ne.s32.totalorder %s838_s17, %s834_s16  ;;  %p50_p9 = scmp.eq.s32.totalorder %s850_s20, 0 }
  0x15   : > { %s1056_s12 = smov (%p35_p7, %s33_s12), 0  ;;  %p55_p10 = scmp.ne.s32.totalorder %s834_s16, %s830_s15 }
  0x16   : > { %s37_s23 = ssub.s32 %s846_s19, %s1056_s12  ;;  %p144_p11 = scmp.eq.s32.totalorder %s561_s21, 1 }
  0x17   : > { %p40_p12 = scmp.eq.s32.totalorder %s37_s23, 0  ;;  %p953_p13 = por %p917_p1, %p55_p10 }
  0x18   : > { %p957_p0 = por %p144_p11, %p49_p8  ;;  %p150_p2 = scmp.eq.s32.totalorder %s562_s13, 1 }
  0x19   : > { %s962_s27 = scalar_select %p40_p12, %s838_s17, %s42_s14  }
  0x1a   : > { %p51_p4 = por %p50_p9, %p49_p8  ;;  %p964_p5 = por %p150_p2, %p55_p10 }
  0x1b   : > { %s201_s29 = sand.u32 1, %s838_s17   ;;  %s568_s21 = sshll.u32 %s846_s19, 3 }
  0x1c   : > { %p611_p7 = scmp.lt.s32.totalorder %s850_s20, 2  ;;  %s567_s30 = sshll.u32 %s201_s29, 3 }
  0x1d   : > { %s210_s7 = scalar_lea.hbm %s1040_s0, %s568_s21  ;;  %s205_s9 = scalar_lea.vmem [#allocation2], %s567_s30 }
  0x1e   : > { %s212_s8 = sshll.u32 %s210_s7, 4  ;;  %s214_s10 = sshll.u32 %s205_s9, 4  ;;  %s213_s8 = int_to_ptr.hbm [resolvable:$true] %s212_s8  ;;  %s215_s10 = int_to_ptr.vmem [resolvable:$true] %s214_s10 }
  0x1f   : > { %p602_p11 = pnand %p611_p7, %p51_p4  ;;  %s202_s11 = scalar_lea.sflag [#allocation3], %s201_s29 }
  0x20   : > { %223 = sbr.rel (%p925_p3) target bundleno = 837 (0x345), region = 36  ;;  %s977_s13 = sand.u32 (!%p925_p3), 1, %s834_s16  }
  0x21   : > { %604 = dma.hbm_to_vmem [thread:$0]  (!%p602_p11), %s213_s8, 128, %s215_s10, %s202_s11  }
  0x22   : > { %s570_s14 = sshll.u32 (!%p925_p3), %s977_s13, 3  ;;  %s226_s23 = scalar_lea.sflag (!%p925_p3), [#allocation3], %s977_s13 }
  0x23   : > { %s229_s21 = scalar_lea.vmem (!%p925_p3), [#allocation2], %s570_s14 }
  0x25   : > { %817 = dma.done.wait (%p953_p13), %s226_s23, 128  }
  0x26   : > { %819 = vsyncadd (%p953_p13), %s226_s23, 4294967168 }
  0x27   : > { %821 = dma.done.wait (%p917_p1), [#allocation6], 3584  }
  0x28   : > { %823 = vsyncadd (%p917_p1), [#allocation6], 4294963712  ;;  %v275_v0 = vld [vmem:[#allocation5 + $0x48] sm:$0xff]  ;;  %v272_v1 = vld [vmem:[#allocation5 + $0x30] sm:$0xff]  ;;  %vm278_vm0 = vcmask 261120   ;;  %v342_v15 = vlaneseq  ;;  %vm368_vm2 = vcmask 64512  }
  0x29   : > { %294 = vmatpush.msra.mxu1 %v275_v0  ;;  %v269_v2 = vld [vmem:[#allocation5 + $0x18] sm:$0xff]  ;;  %v266_v3 = vld [vmem:[#allocation5] sm:$0xff]  ;;  %v276_v5 = vld [vmem:[#allocation5 + $0x50] sm:$0xff]  ;;  %s579_s22 = sshll.u32 %s842_s18, 3  ;;  %s264_s6 = scalar_lea.vmem [#allocation8], %s570_s14 }
  0x2a   : > { %v265_v4 = vld [vmem:[%s229_s21] sm:$0xff]  ;;  %v270_v7 = vld [vmem:[#allocation5 + $0x20] sm:$0xff]  ;;  %v267_v8 = vld [vmem:[#allocation5 + $0x8] sm:$0xff]  ;;  %v343_v16 = vshrl.u32 %v342_v15, 7  ;;  %v345_v17 = vand.u32 127, %v342_v15  ;;  %s457_s29 = scalar_lea.hbm %s1044_s4, %s579_s22  ;;  %s459_s7 = sshll.u32 %s264_s6, 4  ;;  %s460_s7 = int_to_ptr.vmem [resolvable:$true] %s459_s7 }
  0x2b   : > { %295 = vmatpush.msra.mxu1 %v272_v1  ;;  %v273_v6 = vld [vmem:[#allocation5 + $0x38] sm:$0xff]  ;;  %v274_v12 = vld [vmem:[#allocation5 + $0x40] sm:$0xff]  ;;  %v271_v13 = vld [vmem:[#allocation5 + $0x28] sm:$0xff]  ;;  %s461_s8 = sshll.u32 %s457_s29, 4  ;;  %s446_s9 = scalar_lea.sflag [#allocation4], %s977_s13  ;;  %s462_s8 = int_to_ptr.hbm [resolvable:$true] %s461_s8 }
  0x2c   : > { %v277_v11 = vld [vmem:[#allocation5 + $0x58] sm:$0xff]  ;;  %v268_v14 = vld [vmem:[#allocation5 + $0x10] sm:$0xff]  ;;  %vm346_vm1 = vcmp.ge.s32.totalorder %v343_v16, %v345_v17  ;;  %v417_v29 = vld [vmem:[#allocation7 + $0x68] sm:$0xff]  ;;  %s778_s18 = sshra.s32 %s462_s8, 4  ;;  %s784_s21 = scalar_lea.hbm %s1044_s4, 16  ;;  %s779_s18 = int_to_ptr.hbm [resolvable:$true] %s778_s18 }
  0x2d   : > { %296 = vmatpush.msra.mxu1 %v269_v2  ;;  %334 = vmatpush.msra.mxu2 %v277_v11  ;;  %v419_v27 = vld [vmem:[#allocation7 + $0x78] sm:$0xff]  ;;  %v418_v28 = vld [vmem:[#allocation7 + $0x70] sm:$0xff]  ;;  %v416_v30 = vld [vmem:[#allocation7 + $0x60] sm:$0xff]  ;;  %s780_s10 = scalar_lea.hbm %s779_s18, 8  ;;  %p785_p9 = scmp.lt.s32.totalorder %s779_s18, %s1044_s4 }
  0x2e   : > { %424 = vmatpush.msra.mxu0 %v419_v27  ;;  %v415_v31 = vld [vmem:[#allocation7 + $0x58] sm:$0xff]  ;;  %v414_v32 = vld [vmem:[#allocation7 + $0x50] sm:$0xff]  ;;  %v413_v33 = vld [vmem:[#allocation7 + $0x48] sm:$0xff]  ;;  %p781_p1 = scmp.ne.s32.totalorder %s779_s18, %s780_s10  ;;  %p786_p10 = scmp.lt.s32.totalorder %s784_s21, %s780_s10 }
  0x2f   : > { %297 = vmatpush.msra.mxu1 %v266_v3  ;;  %335 = vmatpush.msra.mxu2 %v274_v12  ;;  %v412_v34 = vld [vmem:[#allocation7 + $0x40] sm:$0xff]  ;;  %v411_v35 = vld [vmem:[#allocation7 + $0x38] sm:$0xff]  ;;  %v410_v36 = vld [vmem:[#allocation7 + $0x30] sm:$0xff] }
  0x30   : > { %574 = vmatmul.msk.f32.vlgmr.msra.gmra.mxu1 %vm278_vm0, %v265_v4  ;;  %425 = vmatpush.msra.mxu0 %v418_v28  ;;  %v409_v37 = vld [vmem:[#allocation7 + $0x28] sm:$0xff]  ;;  %v408_v39 = vld [vmem:[#allocation7 + $0x20] sm:$0xff]  ;;  %v407_v41 = vld [vmem:[#allocation7 + $0x18] sm:$0xff]  ;;  %p782_p3 = pnand %p781_p1, %p957_p0  ;;  %p787_p12 = por %p786_p10, %p785_p9 }
  0x31   : > { %314 = vmatpush.msrb.mxu1 %v276_v5  ;;  %336 = vmatpush.msra.mxu2 %v271_v13  ;;  %v406_v42 = vld [vmem:[#allocation7 + $0x10] sm:$0xff]  ;;  %v405_v43 = vld [vmem:[#allocation7 + $0x8] sm:$0xff]  ;;  %v404_v46 = vld [vmem:[#allocation7] sm:$0xff] }
  0x32   : > { %426 = vmatpush.msra.mxu0 %v417_v29  ;;  %v669_v48 = vld [vmem:[%s1043_s3] ss:$0 sm:$0xff]  ;;  %p783_p8 = pneg %p782_p3 }
  0x33   : > { %315 = vmatpush.msrb.mxu1 %v273_v6  ;;  %337 = vmatpush.msra.mxu2 %v268_v14 }
  0x34   : > { %576 = vmatmul.msk.f32.vlgmr.msra.gmra.mxu2 %vm278_vm0, %v265_v4  ;;  %427 = vmatpush.msra.mxu0 %v416_v30  ;;  %p788_p13 = pnand %p787_p12, %p783_p8 }
  0x35   : > { %316 = vmatpush.msrb.mxu1 %v270_v7 }
  0x36   : > { %428 = vmatpush.msra.mxu0 %v415_v31 }
  0x37   : > { %317 = vmatpush.msrb.mxu1 %v267_v8 }
  0x38   : > { %575 = vmatmul.msk.f32.vlgmr.msrb.gmra.mxu1 %vm278_vm0, %v265_v4  ;;  %429 = vmatpush.msra.mxu0 %v414_v32 }
  0x3a   : > { %430 = vmatpush.msra.mxu0 %v413_v33 }
  0x3c   : > { %431 = vmatpush.msra.mxu0 %v412_v34 }
  0x3e   : > { %432 = vmatpush.msra.mxu0 %v411_v35 }
  0x40   : > { %433 = vmatpush.msra.mxu0 %v410_v36 }
  0x42   : > { %434 = vmatpush.msra.mxu0 %v409_v37 }
  0x44   : > { %435 = vmatpush.msra.mxu0 %v408_v39 }
  0x46   : > { %436 = vmatpush.msra.mxu0 %v407_v41 }
  0x48   : > { %437 = vmatpush.msra.mxu0 %v406_v42 }
  0x4a   : > { %438 = vmatpush.msra.mxu0 %v405_v43 }
  0x4c   : > { %439 = vmatpush.msra.mxu0 %v404_v46 }
  0xad   : > { %v299_v9 = vpop.f32.mrf.mxu1 }
  0xb5   : > { %v319_v10 = vpop.f32.mrf.mxu1 }
  0xb6   : > { %362 = vmatpush.xpose.msra.mxu3 %v319_v10 }
  0xb7   : > { %v339_v26 = vpop.f32.mrf.mxu2 }
  0xb9   : > { %363 = vmatmul.f32.vlgmr.msra.gmra.mxu3 %v299_v9 }
  0xba   : > { %399 = vmatpush.msrb.mxu3 %v339_v26 }
 0x13c   : > { %v364_v18 = vpop.f32.mrf.mxu3 }
 0x13d   : > { %v367_v19 = vsel %vm346_vm1, %v364_v18, -1e+30 }
 0x13e   : > { %v369_v20 = vsel %vm368_vm2, %v367_v19, -inf }
 0x13f   : > { %370 = vmax.xlane.f32.xlu0 %v369_v20 }
 0x1b2   : > { %v371_v21 = vpop.xlane.xlu0 %370 }
 0x1b3   : > { %v372_v22 = vsub.f32 %v367_v19, %v371_v21 }
 0x1b5   : > { %v373_v23 = vmul.f32 1.442695, %v372_v22 }
 0x1b7   : > { %670 = vpow2.f32 %v373_v23 }
 0x1bd   : > { %v671_v24 = vpop.eup %670 }
 0x1be   : > { %v375_v25 = vsel %vm368_vm2, %v671_v24, 0.0 }
 0x1bf   : > { %376 = vadd.xlane.f32.xlu0 %v375_v25 }
 0x232   : > { %v377_v38 = vpop.xlane.xlu0 %376 }
 0x233   : > { %v378_v40 = vadd.f32 1e-06, %v377_v38 }
 0x235   : > { %672 = vrcp.f32 %v378_v40 }
 0x23b   : > { %v673_v44 = vpop.eup %672 }
 0x23c   : > { %v380_v45 = vmul.f32 %v673_v44, %v671_v24 }
 0x23e   : > { %577 = vmatmul.msk.f32.vlgmr.msrb.gmra.mxu3 %vm368_vm2, %v380_v45 }
 0x2c1   : > { %v401_v47 = vpop.f32.mrf.mxu3 }
 0x2c2   : > { %440 = vmatmul.f32.vlgmr.msra.gmra.mxu0 %v401_v47 }
 0x33f   : > { %v441_v49 = vpop.f32.mrf.mxu0 }
 0x340   : > { %v442_v50 = vadd.f32 %v669_v48, %v441_v49 }
 0x342   : > { %444 = vst [vmem:[%s264_s6] sm:$0xff] %v442_v50 }
 0x343   : > { %791 = shalt.err (!%p788_p13)
}
 0x344   : > { %592 = dma.vmem_to_hbm [thread:$0]  (%p957_p0), %s460_s7, 128, %s462_s8, %s446_s9  }
 0x345 PF: > { %s473_s13 = sand.u32 1, %s830_s15   ;;  %p606_p2 = pnand %p566_p6, %p964_p5 }
 0x346   : > { %s474_s26 = scalar_lea.sflag [#allocation4], %s473_s13 }
 0x347   : > { %p607_p4 = pneg %p606_p2 }
 0x349   : > { %825 = dma.done.wait (%p607_p4), %s474_s26, 128  }
 0x34a   : > { %827 = vsyncadd (%p607_p4), %s474_s26, 4294967168  ;;  %s21_s20 = sadd.s32 1, %s850_s20   ;;  %s1050_s15 = smov %s834_s16 }
 0x34b   : > { %p18_p7 = scmp.ge.s32.totalorder %s21_s20, 4   ;;  %s1051_s16 = smov %s838_s17 }
 0x34c   : > { %s1052_s17 = smov %s962_s27  ;;  %s1053_s18 = smov %s846_s19 }
 0x34d   : > { %s1054_s19 = smov %s1056_s12  ;;  %20 = sbr.rel (!%p18_p7) target bundleno = 7 (0x7), region = 89 }
 0x352   :  { %480 = vsyncpa [#allocation3], 1 }
 0x353   :  { %482 = vsyncpa [#allocation3 + $0x1], 1 }
 0x354   :  { %483 = vsyncpa [#allocation6], 1 }
 0x355   :  { %484 = vsyncpa [#allocation4], 1 }
 0x356   :  { %486 = vsyncpa [#allocation4 + $0x1], 1 }

</bundles_post_ra>
